<compile_context>
chip_gen: v6e
topology: v6e:2x2x1
jax: 0.10.0
libtpu: 0.0.40
codegen_flags: <defaults>
</compile_context>

<pallas_src>
import jax
import jax.numpy as jnp
from jax.experimental import pallas as pl
from jax.experimental.pallas import tpu as pltpu


# ---------------------------------------------------------------------------
# Path 1 (preferred): zero-copy pass-through via output/input aliasing.
# ---------------------------------------------------------------------------
def _aliased_passthrough_kernel(x_hbm_ref, o_hbm_ref, flag_smem):
    # The output HBM buffer aliases the input HBM buffer
    # (input_output_aliases={0: 0}), so BasicOperation's pass-through needs
    # *no* data movement at all.  Touch a scalar SMEM scratch so the kernel
    # body is non-empty; this is a single sst and otherwise free.
    del x_hbm_ref, o_hbm_ref
    flag_smem[0] = jnp.int32(0)


def _passthrough_aliased(x: jax.Array) -> jax.Array:
    return pl.pallas_call(
        _aliased_passthrough_kernel,
        out_shape=jax.ShapeDtypeStruct(x.shape, x.dtype),
        in_specs=[pl.BlockSpec(memory_space=pl.ANY)],   # stays in HBM, no auto-DMA
        out_specs=pl.BlockSpec(memory_space=pl.ANY),
        scratch_shapes=[pltpu.SMEM((1,), jnp.int32)],
        input_output_aliases={0: 0},                    # output buffer IS the input buffer
    )(x)


# ---------------------------------------------------------------------------
# Path 2: explicit copy as a direct HBM->HBM DMA (no VMEM bounce, no VPU).
# ---------------------------------------------------------------------------
def _hbm_copy_kernel(x_hbm_ref, o_hbm_ref, copy_sem):
    # One whole-array DMA at HBM roofline.  No vld/vst path, no tiling
    # heuristics, works for arbitrary shapes/dtypes, zero VMEM pressure
    # (safe within v7x's 64 MiB VMEM regardless of input size).
    cp = pltpu.make_async_copy(x_hbm_ref, o_hbm_ref, copy_sem)
    cp.start()
    cp.wait()


def _passthrough_copy(x: jax.Array) -> jax.Array:
    return pl.pallas_call(
        _hbm_copy_kernel,
        out_shape=jax.ShapeDtypeStruct(x.shape, x.dtype),
        in_specs=[pl.BlockSpec(memory_space=pl.ANY)],
        out_specs=pl.BlockSpec(memory_space=pl.ANY),
        scratch_shapes=[pltpu.SemaphoreType.DMA],
    )(x)


def basic_operation_forward(x: jax.Array, *, alias_output: bool = True) -> jax.Array:
    """Forward pass of BasicOperation (exact pass-through).

    alias_output=True  -> zero-copy: output aliases the input HBM buffer.
    alias_output=False -> materialize a distinct output via one HBM->HBM DMA.
    """
    if alias_output:
        return _passthrough_aliased(x)
    return _passthrough_copy(x)


if __name__ == "__main__":
    key = jax.random.PRNGKey(0)
    # NCHW input, as a PyTorch module would see it.
    x = jax.random.normal(key, (2, 4, 16, 16), dtype=jnp.float32)

    # Primary (zero-copy aliased) path.
    y = basic_operation_forward(x)
    y = jax.block_until_ready(y)
    assert y.shape == x.shape, (y.shape, x.shape)
    assert y.dtype == x.dtype, (y.dtype, x.dtype)
    assert bool(jnp.all(y == x)), "aliased output does not match input"

    # Explicit-copy (HBM->HBM DMA) path.
    y2 = basic_operation_forward(x, alias_output=False)
    y2 = jax.block_until_ready(y2)
    assert y2.shape == x.shape, (y2.shape, x.shape)
    assert y2.dtype == x.dtype, (y2.dtype, x.dtype)
    assert bool(jnp.all(y2 == x)), "copied output does not match input"

    print("KERNEL_OK")
</pallas_src>

<mosaic_0001>
module attributes {stable_mosaic.version = 11 : i64} {
  func.func @_aliased_passthrough_kernel(%arg0: memref<2x4x16x16xf32, #tpu.memory_space<any>>, %arg1: memref<2x4x16x16xf32, #tpu.memory_space<any>>, %arg2: memref<1xi32, #tpu.memory_space<smem>>) attributes {dimension_semantics = [], scalar_prefetch = 0 : i64, scratch_operands = 1 : i64, tpu.core_type = #tpu.core_type<tc>} {
    %c0_i32 = arith.constant 0 : i32
    %c0 = arith.constant 0 : index
    %0 = memref.load %arg2[%c0] : memref<1xi32, #tpu.memory_space<smem>>
    memref.store %c0_i32, %arg2[%c0] : memref<1xi32, #tpu.memory_space<smem>>
    return
  }
}

</mosaic_0001>

<bundles_post_ra>
// kernel: tpu_custom_call.1
= control target key start
LH: loop header
LB: loop body
LE: loop exit
PB: predicated region body
PF: predicated region fallthrough
CT: control target
= control target key end

     0   :  { %s18_s0 = inlined_call_operand.hbm [shape: f32[2,4,16,16], index: 0, kind: input, shape index: {}, may-alias: {0,1}]   ;;  %s19_s1 = inlined_call_operand.hbm [shape: f32[2,4,16,16], index: 1, kind: output, shape index: {}, may-alias: {0,1}]  }

</bundles_post_ra>
